<compile_context>
chip_gen: v5e
topology: v5e:2x2
jax: 0.10.0
libtpu: 0.0.40
codegen_flags: <defaults>
</compile_context>

<pallas_src>
import functools

import jax
import jax.numpy as jnp
from jax import lax
from jax.experimental import pallas as pl
from jax.experimental.pallas import tpu as pltpu


def _round_up(x, m):
    return (x + m - 1) // m * m


def _pick_strip_rows(H):
    # Prefer ~4-row strips: keeps the per-strip accumulator in vregs and gives
    # each TensorCore several grid steps to pipeline.
    for s in (4, 8, 2, 1):
        if H % s == 0:
            return s
    return 1


def conv_block_kernel(x_ref, scale_ref, shift_ref, w_ref, b_ref, o_ref, *, H, W, S):
    """One (batch image, row strip) per grid step.

    x_ref     : (1, Hp, Wp, Cin)  f32   padded input image (spatial halo only);
                                        block index is constant over the strip
                                        axis -> DMA'd once per image.
    scale_ref : (1, Cin)          f32   gamma / sqrt(var+eps)
    shift_ref : (1, Cin)          f32   beta - mean*scale
    w_ref     : (9, Cin, Cout)    bf16  conv taps, tap index = kh*3 + kw
    b_ref     : (1, Cout)         f32   conv bias
    o_ref     : (1, S*Wp, Cout)   f32   conv output for this strip (valid rows
                                        only; halo/alignment *columns* are
                                        discarded by the wrapper)
    """
    s = pl.program_id(1)
    Wp, Cin = x_ref.shape[2], x_ref.shape[3]
    Cout = o_ref.shape[2]
    rows = S + 2                      # strip + 1-row halo above and below
    Ms = rows * Wp

    # Slice this strip's input rows (major-dim slice: cheap, no relayout).
    row0 = pl.multiple_of(s * S, S)
    xs = x_ref[0, pl.ds(row0, rows)]                       # (rows, Wp, Cin) f32

    # BN affine + ReLU in f32 on the VPU.  The conv zero-padding ring (global
    # padded row 0 / H+1, padded col 0 / >W) is zeroed *after* activation, to
    # match PyTorch conv zero-padding of the post-activation tensor.  Masks
    # come from iotas -- no mask array in VMEM, no extra DMA stream.
    scale = scale_ref[...].reshape(1, 1, Cin)
    shift = shift_ref[...].reshape(1, 1, Cin)
    r = lax.broadcasted_iota(jnp.int32, (rows, Wp, Cin), 0) + s * S   # global padded row
    c = lax.broadcasted_iota(jnp.int32, (rows, Wp, Cin), 1)           # padded col
    keep = (r >= 1) & (r <= H) & (c >= 1) & (c <= W)
    xn = jnp.where(keep, jnp.maximum(xs * scale + shift, 0.0), 0.0)

    # Flatten strip spatial dims into the matmul M dim (Wp % 8 == 0 -> the
    # reshape is layout-preserving / free).
    xf = xn.reshape(Ms, Cin)

    # 3x3 conv == 9 tap-shifted matmuls.  Each tap shift is a static sublane
    # rotation of the flattened strip; wrap-around only ever sources zeroed
    # halo rows or lands on the halo output rows dropped below, so every
    # valid output position is exact.  bf16 at the MXU boundary, f32 acc.
    acc = None
    for kh in range(3):
        for kw in range(3):
            off = (kh - 1) * Wp + (kw - 1)
            tap = xf if off == 0 else pltpu.roll(xf, (-off) % Ms, axis=0)
            d = jnp.dot(tap.astype(jnp.bfloat16), w_ref[kh * 3 + kw],
                        preferred_element_type=jnp.float32)
            acc = d if acc is None else acc + d

    # Keep only the strip's S valid output rows (+ bias).  Offset Wp and
    # length S*Wp are multiples of 8, so the slice is sublane-tile aligned.
    o_ref[0] = acc[Wp:Wp + S * Wp, :] + b_ref[...]


def conv_block_forward(x_nchw, gamma, beta, w_oihw, conv_bias, *, eps=1e-5):
    """BN (training-mode batch stats) -> ReLU -> Conv2d(3x3, stride 1, pad 1)."""
    x_nchw = x_nchw.astype(jnp.float32)
    N, Cin, H, W = x_nchw.shape
    Cout = w_oihw.shape[0]

    S = _pick_strip_rows(H)
    n_strips = H // S
    Hp = H + 2
    Wp = _round_up(W + 2, 8)          # sublane-aligned -> free in-kernel flatten

    # --- BN training-mode batch statistics folded to per-channel scale/shift.
    mean = jnp.mean(x_nchw, axis=(0, 2, 3))                 # (Cin,)
    var = jnp.var(x_nchw, axis=(0, 2, 3))                   # biased, like PyTorch BN
    scale_v = gamma.astype(jnp.float32) / jnp.sqrt(var + eps)
    shift_v = beta.astype(jnp.float32) - mean * scale_v
    scale = scale_v.reshape(1, Cin)
    shift = shift_v.reshape(1, Cin)

    # NHWC with a 1px spatial halo (+ right alignment cols).  Channels stay
    # UNPADDED so the input DMA carries only real data.
    x_nhwc = jnp.transpose(x_nchw, (0, 2, 3, 1))
    xp = jnp.pad(x_nhwc, ((0, 0), (1, 1), (1, Wp - W - 1), (0, 0)))

    # OIHW -> (tap, Cin, Cout), bf16 for the MXU (unpadded: a few hundred bytes).
    w_taps = jnp.transpose(w_oihw.astype(jnp.float32), (2, 3, 1, 0)) \
                .reshape(9, Cin, Cout).astype(jnp.bfloat16)
    bias = conv_bias.astype(jnp.float32).reshape(1, Cout)

    kernel = functools.partial(conv_block_kernel, H=H, W=W, S=S)

    out_flat = pl.pallas_call(
        kernel,
        out_shape=jax.ShapeDtypeStruct((N, H * Wp, Cout), jnp.float32),
        grid_spec=pltpu.PrefetchScalarGridSpec(
            num_scalar_prefetch=0,
            grid=(N, n_strips),
            in_specs=[
                # Full padded image per batch element; constant over the strip
                # axis so it is fetched once per image.
                pl.BlockSpec((1, Hp, Wp, Cin), lambda n, s: (n, 0, 0, 0)),
                pl.BlockSpec((1, Cin), lambda n, s: (0, 0)),
                pl.BlockSpec((1, Cin), lambda n, s: (0, 0)),
                pl.BlockSpec((9, Cin, Cout), lambda n, s: (0, 0, 0)),
                pl.BlockSpec((1, Cout), lambda n, s: (0, 0)),
            ],
            out_specs=pl.BlockSpec((1, S * Wp, Cout), lambda n, s: (n, s, 0)),
        ),
        compiler_params=pltpu.CompilerParams(
            dimension_semantics=("parallel", "parallel"),
            vmem_limit_bytes=32 * 1024 * 1024),
    )(xp, scale, shift, w_taps, bias)

    # Drop the width halo / alignment columns, back to NCHW.
    out = out_flat.reshape(N, H, Wp, Cout)[:, :, 1:W + 1, :]
    return jnp.transpose(out, (0, 3, 1, 2))


def reference_forward(x_nchw, gamma, beta, w_oihw, conv_bias, *, eps=1e-5):
    """Plain-JAX f32 reference of the PyTorch ConvBlock forward (training-mode BN)."""
    mean = jnp.mean(x_nchw, axis=(0, 2, 3))
    var = jnp.var(x_nchw, axis=(0, 2, 3))
    xn = (x_nchw - mean[None, :, None, None]) * (
        gamma[None, :, None, None] / jnp.sqrt(var[None, :, None, None] + eps)
    ) + beta[None, :, None, None]
    xn = jnp.maximum(xn, 0.0)
    out = lax.conv_general_dilated(
        xn, w_oihw, window_strides=(1, 1), padding=((1, 1), (1, 1)),
        dimension_numbers=("NCHW", "OIHW", "NCHW"))
    return out + conv_bias[None, :, None, None]


if __name__ == "__main__":
    # Small, deterministic example: ConvBlock(in_channels=4, out_channels=8)
    N, Cin, H, W = 2, 4, 16, 16
    Cout = 8

    key = jax.random.PRNGKey(0)
    kx, kw, kb, kg, kbe = jax.random.split(key, 5)

    x = jax.random.normal(kx, (N, Cin, H, W), jnp.float32)
    conv_w = jax.random.normal(kw, (Cout, Cin, 3, 3), jnp.float32) * 0.1   # OIHW
    conv_b = jax.random.normal(kb, (Cout,), jnp.float32) * 0.1
    gamma = 1.0 + 0.1 * jax.random.normal(kg, (Cin,), jnp.float32)         # BN weight
    beta = 0.1 * jax.random.normal(kbe, (Cin,), jnp.float32)               # BN bias

    out = conv_block_forward(x, gamma, beta, conv_w, conv_b)
    out = jax.block_until_ready(out)

    ref = reference_forward(x, gamma, beta, conv_w, conv_b)
    assert out.shape == (N, Cout, H, W)
    err = jnp.max(jnp.abs(out - ref))
    # bf16 MXU operands with f32 accumulation -> looser tolerance than pure f32.
    assert jnp.allclose(out, ref, atol=5e-2, rtol=5e-2), f"max abs diff {err}"

    print("KERNEL_OK")
</pallas_src>

<mosaic_0001>
module attributes {stable_mosaic.version = 11 : i64} {
  func.func @conv_block_kernel(%arg0: i32, %arg1: i32, %arg2: memref<1x18x24x4xf32, #tpu.memory_space<vmem>>, %arg3: memref<1x4xf32, #tpu.memory_space<vmem>>, %arg4: memref<1x4xf32, #tpu.memory_space<vmem>>, %arg5: memref<9x4x8xbf16, #tpu.memory_space<vmem>>, %arg6: memref<1x8xf32, #tpu.memory_space<vmem>>, %arg7: memref<1x96x8xf32, #tpu.memory_space<vmem>>) attributes {dimension_semantics = [#tpu.dimension_semantics<parallel>, #tpu.dimension_semantics<parallel>], iteration_bounds = array<i64: 2, 4>, scalar_prefetch = 0 : i64, scratch_operands = 0 : i64, tpu.core_type = #tpu.core_type<tc>, window_params = [{transform_indices = @transform_0, window_bounds = array<i64: 1, 18, 24, 4>}, {pipeline_mode = #tpu.pipeline_mode<synchronous>, transform_indices = @transform_1, window_bounds = array<i64: 1, 4>}, {pipeline_mode = #tpu.pipeline_mode<synchronous>, transform_indices = @transform_2, window_bounds = array<i64: 1, 4>}, {pipeline_mode = #tpu.pipeline_mode<synchronous>, transform_indices = @transform_3, window_bounds = array<i64: 9, 4, 8>}, {pipeline_mode = #tpu.pipeline_mode<synchronous>, transform_indices = @transform_4, window_bounds = array<i64: 1, 8>}, {transform_indices = @transform_5, window_bounds = array<i64: 1, 96, 8>}]} {
    %c4_i32 = arith.constant 4 : i32
    %0 = arith.muli %arg1, %c4_i32 : i32
    %1 = tpu.assume_multiple %0, 4 : i32
    %c0 = arith.constant 0 : index
    %2 = arith.index_cast %1 : i32 to index
    %c0_0 = arith.constant 0 : index
    %c0_1 = arith.constant 0 : index
    %3 = vector.load %arg2[%c0, %2, %c0_0, %c0_1] : memref<1x18x24x4xf32, #tpu.memory_space<vmem>>, vector<1x6x24x4xf32>
    %4 = vector.shape_cast %3 : vector<1x6x24x4xf32> to vector<6x24x4xf32>
    %c0_2 = arith.constant 0 : index
    %c0_3 = arith.constant 0 : index
    %5 = vector.load %arg3[%c0_2, %c0_3] : memref<1x4xf32, #tpu.memory_space<vmem>>, vector<1x4xf32>
    %6 = vector.shape_cast %5 : vector<1x4xf32> to vector<1x1x4xf32>
    %c0_4 = arith.constant 0 : index
    %c0_5 = arith.constant 0 : index
    %7 = vector.load %arg4[%c0_4, %c0_5] : memref<1x4xf32, #tpu.memory_space<vmem>>, vector<1x4xf32>
    %8 = vector.shape_cast %7 : vector<1x4xf32> to vector<1x1x4xf32>
    %9 = tpu.iota {dimensions = array<i32: 0>} : vector<6x24x4xi32>
    %c4_i32_6 = arith.constant 4 : i32
    %10 = arith.muli %arg1, %c4_i32_6 : i32
    %11 = vector.broadcast %10 : i32 to vector<6x24x4xi32>
    %12 = arith.addi %9, %11 : vector<6x24x4xi32>
    %13 = tpu.iota {dimensions = array<i32: 1>} : vector<6x24x4xi32>
    %c1_i32 = arith.constant 1 : i32
    %14 = vector.broadcast %c1_i32 : i32 to vector<6x24x4xi32>
    %15 = arith.cmpi sge, %12, %14 : vector<6x24x4xi32>
    %c16_i32 = arith.constant 16 : i32
    %16 = vector.broadcast %c16_i32 : i32 to vector<6x24x4xi32>
    %17 = arith.cmpi sle, %12, %16 : vector<6x24x4xi32>
    %18 = arith.andi %15, %17 : vector<6x24x4xi1>
    %c1_i32_7 = arith.constant 1 : i32
    %19 = vector.broadcast %c1_i32_7 : i32 to vector<6x24x4xi32>
    %20 = arith.cmpi sge, %13, %19 : vector<6x24x4xi32>
    %21 = arith.andi %18, %20 : vector<6x24x4xi1>
    %c16_i32_8 = arith.constant 16 : i32
    %22 = vector.broadcast %c16_i32_8 : i32 to vector<6x24x4xi32>
    %23 = arith.cmpi sle, %13, %22 : vector<6x24x4xi32>
    %24 = arith.andi %21, %23 : vector<6x24x4xi1>
    %25 = vector.broadcast %6 : vector<1x1x4xf32> to vector<6x24x4xf32>
    %26 = arith.mulf %4, %25 : vector<6x24x4xf32>
    %27 = vector.broadcast %8 : vector<1x1x4xf32> to vector<6x24x4xf32>
    %28 = arith.addf %26, %27 : vector<6x24x4xf32>
    %cst = arith.constant 0.000000e+00 : f32
    %29 = vector.broadcast %cst : f32 to vector<6x24x4xf32>
    %30 = arith.maximumf %28, %29 : vector<6x24x4xf32>
    %cst_9 = arith.constant 0.000000e+00 : f32
    %31 = vector.broadcast %cst_9 : f32 to vector<6x24x4xf32>
    %32 = arith.select %24, %30, %31 : vector<6x24x4xi1>, vector<6x24x4xf32>
    %33 = vector.shape_cast %32 : vector<6x24x4xf32> to vector<144x4xf32>
    %c25_i32 = arith.constant 25 : i32
    %34 = tpu.dynamic_rotate %33 by %c25_i32 dim 0 : vector<144x4xf32>, i32 -> vector<144x4xf32>
    %35 = arith.truncf %34 : vector<144x4xf32> to vector<144x4xbf16>
    %c0_10 = arith.constant 0 : index
    %c0_11 = arith.constant 0 : index
    %c0_12 = arith.constant 0 : index
    %36 = vector.load %arg5[%c0_10, %c0_11, %c0_12] : memref<9x4x8xbf16, #tpu.memory_space<vmem>>, vector<1x4x8xbf16>
    %37 = vector.shape_cast %36 : vector<1x4x8xbf16> to vector<4x8xbf16>
    %cst_13 = arith.constant dense<0.000000e+00> : vector<144x8xf32>
    %38 = tpu.matmul %35, %37, %cst_13 {dimension_numbers = #tpu.dot_dimension_numbers<[1], [0], [0], [1], [0, 0, 1, 1], [], []>} : vector<144x4xbf16>, vector<4x8xbf16>, vector<144x8xf32> -> vector<144x8xf32>
    %c24_i32 = arith.constant 24 : i32
    %39 = tpu.dynamic_rotate %33 by %c24_i32 dim 0 : vector<144x4xf32>, i32 -> vector<144x4xf32>
    %40 = arith.truncf %39 : vector<144x4xf32> to vector<144x4xbf16>
    %c1 = arith.constant 1 : index
    %c0_14 = arith.constant 0 : index
    %c0_15 = arith.constant 0 : index
    %41 = vector.load %arg5[%c1, %c0_14, %c0_15] : memref<9x4x8xbf16, #tpu.memory_space<vmem>>, vector<1x4x8xbf16>
    %42 = vector.shape_cast %41 : vector<1x4x8xbf16> to vector<4x8xbf16>
    %cst_16 = arith.constant dense<0.000000e+00> : vector<144x8xf32>
    %43 = tpu.matmul %40, %42, %cst_16 {dimension_numbers = #tpu.dot_dimension_numbers<[1], [0], [0], [1], [0, 0, 1, 1], [], []>} : vector<144x4xbf16>, vector<4x8xbf16>, vector<144x8xf32> -> vector<144x8xf32>
    %44 = arith.addf %38, %43 : vector<144x8xf32>
    %c23_i32 = arith.constant 23 : i32
    %45 = tpu.dynamic_rotate %33 by %c23_i32 dim 0 : vector<144x4xf32>, i32 -> vector<144x4xf32>
    %46 = arith.truncf %45 : vector<144x4xf32> to vector<144x4xbf16>
    %c2 = arith.constant 2 : index
    %c0_17 = arith.constant 0 : index
    %c0_18 = arith.constant 0 : index
    %47 = vector.load %arg5[%c2, %c0_17, %c0_18] : memref<9x4x8xbf16, #tpu.memory_space<vmem>>, vector<1x4x8xbf16>
    %48 = vector.shape_cast %47 : vector<1x4x8xbf16> to vector<4x8xbf16>
    %cst_19 = arith.constant dense<0.000000e+00> : vector<144x8xf32>
    %49 = tpu.matmul %46, %48, %cst_19 {dimension_numbers = #tpu.dot_dimension_numbers<[1], [0], [0], [1], [0, 0, 1, 1], [], []>} : vector<144x4xbf16>, vector<4x8xbf16>, vector<144x8xf32> -> vector<144x8xf32>
    %50 = arith.addf %44, %49 : vector<144x8xf32>
    %c1_i32_20 = arith.constant 1 : i32
    %51 = tpu.dynamic_rotate %33 by %c1_i32_20 dim 0 : vector<144x4xf32>, i32 -> vector<144x4xf32>
    %52 = arith.truncf %51 : vector<144x4xf32> to vector<144x4xbf16>
    %c3 = arith.constant 3 : index
    %c0_21 = arith.constant 0 : index
    %c0_22 = arith.constant 0 : index
    %53 = vector.load %arg5[%c3, %c0_21, %c0_22] : memref<9x4x8xbf16, #tpu.memory_space<vmem>>, vector<1x4x8xbf16>
    %54 = vector.shape_cast %53 : vector<1x4x8xbf16> to vector<4x8xbf16>
    %cst_23 = arith.constant dense<0.000000e+00> : vector<144x8xf32>
    %55 = tpu.matmul %52, %54, %cst_23 {dimension_numbers = #tpu.dot_dimension_numbers<[1], [0], [0], [1], [0, 0, 1, 1], [], []>} : vector<144x4xbf16>, vector<4x8xbf16>, vector<144x8xf32> -> vector<144x8xf32>
    %56 = arith.addf %50, %55 : vector<144x8xf32>
    %57 = arith.truncf %33 : vector<144x4xf32> to vector<144x4xbf16>
    %c4 = arith.constant 4 : index
    %c0_24 = arith.constant 0 : index
    %c0_25 = arith.constant 0 : index
    %58 = vector.load %arg5[%c4, %c0_24, %c0_25] : memref<9x4x8xbf16, #tpu.memory_space<vmem>>, vector<1x4x8xbf16>
    %59 = vector.shape_cast %58 : vector<1x4x8xbf16> to vector<4x8xbf16>
    %cst_26 = arith.constant dense<0.000000e+00> : vector<144x8xf32>
    %60 = tpu.matmul %57, %59, %cst_26 {dimension_numbers = #tpu.dot_dimension_numbers<[1], [0], [0], [1], [0, 0, 1, 1], [], []>} : vector<144x4xbf16>, vector<4x8xbf16>, vector<144x8xf32> -> vector<144x8xf32>
    %61 = arith.addf %56, %60 : vector<144x8xf32>
    %c143_i32 = arith.constant 143 : i32
    %62 = tpu.dynamic_rotate %33 by %c143_i32 dim 0 : vector<144x4xf32>, i32 -> vector<144x4xf32>
    %63 = arith.truncf %62 : vector<144x4xf32> to vector<144x4xbf16>
    %c5 = arith.constant 5 : index
    %c0_27 = arith.constant 0 : index
    %c0_28 = arith.constant 0 : index
    %64 = vector.load %arg5[%c5, %c0_27, %c0_28] : memref<9x4x8xbf16, #tpu.memory_space<vmem>>, vector<1x4x8xbf16>
    %65 = vector.shape_cast %64 : vector<1x4x8xbf16> to vector<4x8xbf16>
    %cst_29 = arith.constant dense<0.000000e+00> : vector<144x8xf32>
    %66 = tpu.matmul %63, %65, %cst_29 {dimension_numbers = #tpu.dot_dimension_numbers<[1], [0], [0], [1], [0, 0, 1, 1], [], []>} : vector<144x4xbf16>, vector<4x8xbf16>, vector<144x8xf32> -> vector<144x8xf32>
    %67 = arith.addf %61, %66 : vector<144x8xf32>
    %c121_i32 = arith.constant 121 : i32
    %68 = tpu.dynamic_rotate %33 by %c121_i32 dim 0 : vector<144x4xf32>, i32 -> vector<144x4xf32>
    %69 = arith.truncf %68 : vector<144x4xf32> to vector<144x4xbf16>
    %c6 = arith.constant 6 : index
    %c0_30 = arith.constant 0 : index
    %c0_31 = arith.constant 0 : index
    %70 = vector.load %arg5[%c6, %c0_30, %c0_31] : memref<9x4x8xbf16, #tpu.memory_space<vmem>>, vector<1x4x8xbf16>
    %71 = vector.shape_cast %70 : vector<1x4x8xbf16> to vector<4x8xbf16>
    %cst_32 = arith.constant dense<0.000000e+00> : vector<144x8xf32>
    %72 = tpu.matmul %69, %71, %cst_32 {dimension_numbers = #tpu.dot_dimension_numbers<[1], [0], [0], [1], [0, 0, 1, 1], [], []>} : vector<144x4xbf16>, vector<4x8xbf16>, vector<144x8xf32> -> vector<144x8xf32>
    %73 = arith.addf %67, %72 : vector<144x8xf32>
    %c120_i32 = arith.constant 120 : i32
    %74 = tpu.dynamic_rotate %33 by %c120_i32 dim 0 : vector<144x4xf32>, i32 -> vector<144x4xf32>
    %75 = arith.truncf %74 : vector<144x4xf32> to vector<144x4xbf16>
    %c7 = arith.constant 7 : index
    %c0_33 = arith.constant 0 : index
    %c0_34 = arith.constant 0 : index
    %76 = vector.load %arg5[%c7, %c0_33, %c0_34] : memref<9x4x8xbf16, #tpu.memory_space<vmem>>, vector<1x4x8xbf16>
    %77 = vector.shape_cast %76 : vector<1x4x8xbf16> to vector<4x8xbf16>
    %cst_35 = arith.constant dense<0.000000e+00> : vector<144x8xf32>
    %78 = tpu.matmul %75, %77, %cst_35 {dimension_numbers = #tpu.dot_dimension_numbers<[1], [0], [0], [1], [0, 0, 1, 1], [], []>} : vector<144x4xbf16>, vector<4x8xbf16>, vector<144x8xf32> -> vector<144x8xf32>
    %79 = arith.addf %73, %78 : vector<144x8xf32>
    %c119_i32 = arith.constant 119 : i32
    %80 = tpu.dynamic_rotate %33 by %c119_i32 dim 0 : vector<144x4xf32>, i32 -> vector<144x4xf32>
    %81 = arith.truncf %80 : vector<144x4xf32> to vector<144x4xbf16>
    %c8 = arith.constant 8 : index
    %c0_36 = arith.constant 0 : index
    %c0_37 = arith.constant 0 : index
    %82 = vector.load %arg5[%c8, %c0_36, %c0_37] : memref<9x4x8xbf16, #tpu.memory_space<vmem>>, vector<1x4x8xbf16>
    %83 = vector.shape_cast %82 : vector<1x4x8xbf16> to vector<4x8xbf16>
    %cst_38 = arith.constant dense<0.000000e+00> : vector<144x8xf32>
    %84 = tpu.matmul %81, %83, %cst_38 {dimension_numbers = #tpu.dot_dimension_numbers<[1], [0], [0], [1], [0, 0, 1, 1], [], []>} : vector<144x4xbf16>, vector<4x8xbf16>, vector<144x8xf32> -> vector<144x8xf32>
    %85 = arith.addf %79, %84 : vector<144x8xf32>
    %86 = vector.extract_strided_slice %85 {offsets = [24, 0], sizes = [96, 8], strides = [1, 1]} : vector<144x8xf32> to vector<96x8xf32>
    %c0_39 = arith.constant 0 : index
    %c0_40 = arith.constant 0 : index
    %87 = vector.load %arg6[%c0_39, %c0_40] : memref<1x8xf32, #tpu.memory_space<vmem>>, vector<1x8xf32>
    %88 = vector.broadcast %87 : vector<1x8xf32> to vector<96x8xf32>
    %89 = arith.addf %86, %88 : vector<96x8xf32>
    %c0_41 = arith.constant 0 : index
    %c0_42 = arith.constant 0 : index
    %c0_43 = arith.constant 0 : index
    %90 = vector.load %arg7[%c0_41, %c0_42, %c0_43] : memref<1x96x8xf32, #tpu.memory_space<vmem>>, vector<1x96x8xf32>
    %91 = vector.shape_cast %90 : vector<1x96x8xf32> to vector<96x8xf32>
    %92 = vector.shape_cast %89 : vector<96x8xf32> to vector<1x96x8xf32>
    tpu.vector_store %arg7[%c0_41, %c0_42, %c0_43], %92 {strides = array<i32>} : memref<1x96x8xf32, #tpu.memory_space<vmem>>, vector<1x96x8xf32>,
    return
  }
  func.func @transform_0(%arg0: i32, %arg1: i32) -> (i32, i32, i32, i32) {
    %c0_i32 = arith.constant 0 : i32
    %c0_i32_0 = arith.constant 0 : i32
    %c0_i32_1 = arith.constant 0 : i32
    %c0_i32_2 = arith.constant 0 : i32
    return %arg0, %c0_i32, %c0_i32_0, %c0_i32_1 : i32, i32, i32, i32
  }
  func.func @transform_1(%arg0: i32, %arg1: i32) -> (i32, i32) {
    %c0_i32 = arith.constant 0 : i32
    %c0_i32_0 = arith.constant 0 : i32
    %c0_i32_1 = arith.constant 0 : i32
    return %c0_i32, %c0_i32_0 : i32, i32
  }
  func.func @transform_2(%arg0: i32, %arg1: i32) -> (i32, i32) {
    %c0_i32 = arith.constant 0 : i32
    %c0_i32_0 = arith.constant 0 : i32
    %c0_i32_1 = arith.constant 0 : i32
    return %c0_i32, %c0_i32_0 : i32, i32
  }
  func.func @transform_3(%arg0: i32, %arg1: i32) -> (i32, i32, i32) {
    %c0_i32 = arith.constant 0 : i32
    %c0_i32_0 = arith.constant 0 : i32
    %c0_i32_1 = arith.constant 0 : i32
    %c0_i32_2 = arith.constant 0 : i32
    return %c0_i32, %c0_i32_0, %c0_i32_1 : i32, i32, i32
  }
  func.func @transform_4(%arg0: i32, %arg1: i32) -> (i32, i32) {
    %c0_i32 = arith.constant 0 : i32
    %c0_i32_0 = arith.constant 0 : i32
    %c0_i32_1 = arith.constant 0 : i32
    return %c0_i32, %c0_i32_0 : i32, i32
  }
  func.func @transform_5(%arg0: i32, %arg1: i32) -> (i32, i32, i32) {
    %c0_i32 = arith.constant 0 : i32
    %c0_i32_0 = arith.constant 0 : i32
    return %arg0, %arg1, %c0_i32 : i32, i32, i32
  }
}

</mosaic_0001>

<bundles_post_ra>
// kernel: tpu_custom_call.1
= control target key start
LH: loop header
LB: loop body
LE: loop exit
PB: predicated region body
PF: predicated region fallthrough
CT: control target
= control target key end

     0   :  { %s1605_s18 = smov 0   ;;  %s1607_s19 = smov 0   ;;  %s2483_s0 = inlined_call_operand.vmem [shape: f32[2,18,24,4], index: 0, kind: input, shape index: {}]   ;;  %s2484_s1 = inlined_call_operand.vmem [shape: f32[1,4], index: 1, kind: input, shape index: {}]   ;;  %s2485_s2 = inlined_call_operand.vmem [shape: f32[1,4], index: 2, kind: input, shape index: {}]   ;;  %s2486_s3 = inlined_call_operand.vmem [shape: bf16[9,4,8], index: 3, kind: input, shape index: {}]   ;;  %s2487_s4 = inlined_call_operand.vmem [shape: f32[1,8], index: 4, kind: input, shape index: {}]   ;;  %s2488_s5 = inlined_call_operand.vmem [shape: f32[2,384,8], index: 5, kind: output, shape index: {}]  }
   0x1   :  { %s1609_s20 = smov 0   ;;  %s1611_s21 = smov 0  }
   0x2   :  { %s1613_s22 = smov 0  }
   0x3 LB: > { %s24_s23 = sadd.s32 1, %s1565_s20  ;;  %s27_s24 = sadd.s32 1, %s1569_s21  ;;  %s1573_s22 = sphi %s1613_s22, %s15_s22   ;;  %s1569_s21 = sphi %s1611_s21, %s2614_s21   ;;  %s1565_s20 = sphi %s1609_s20, %s2613_s20   ;;  %s1561_s19 = sphi %s1607_s19, %s2612_s19   ;;  %s1557_s18 = sphi %s1605_s18, %s2611_s18  }
   0x4   : > { %p25_p0 = scmp.ge.s32.totalorder %s24_s23, 4  ;;  %p1391_p1 = scmp.ge.s32.totalorder %s1573_s22, 1 }
   0x5   : > { %p201_p2 = scmp.lt.s32.totalorder %s1573_s22, 9 }
   0x6   : > { %s2616_s23 = smov (%p25_p0, %s24_s23), 0  ;;  %s2618_s24 = smov (!%p25_p0, %s27_s24), %s1569_s21 }
   0x7   : > { %p202_p3 = pnand %p1391_p1, %p201_p2  ;;  %p29_p4 = scmp.ge.s32.totalorder %s2618_s24, 2 }
   0x9   : > { %s2620_s24 = smov (%p29_p4, %s2618_s24), 0  ;;  %205 = sbr.rel (%p202_p3) target bundleno = 492 (0x1ec), region = 40 }
   0xe   : > { %v1396_v0 = vld [vmem:[%s2486_s3 + $0x2] sm:$0x3]  ;;  %vm2489_vm0 = vcmask 1041408   ;;  %p233_p5 = scmp.lt.s32.totalorder %s1561_s19, 1  ;;  %s1394_s27 = sshll.u32 %s1557_s18, 2  ;;  %v278_v1 = vlaneseq }
   0xf   : > { %v508_v2 = vsel %vm2489_vm0, %v1396_v0, 0  ;;  %v272_v3 = vstv %s1394_s27  ;;  %s1395_s28 = smul.u32 96, %s1557_s18  ;;  %v1654_v7 = vld [vmem:[%s2484_s1] ss:$0 sm:$0xff]  ;;  %v1415_v13 = vld [vmem:[%s2486_s3 + $0x4] sm:$0x3] }
  0x10   : > { %1487 = vmatpush.bf16.msra.mxu1 %v508_v2  ;;  %1488 = vmatpush.bf16.msra.mxu2 %v508_v2  ;;  %s2622_s19 = smov (!%p233_p5, %s1561_s19), 1  ;;  %v277_v4 = vadd.s32 5, %v272_v3  ;;  %v1644_v5 = vshrl.u32 %v278_v1, 7  ;;  %vm282_vm1 = vcmp.ge.s32.totalorder %v272_v3, 1  ;;  %vm288_vm2 = vcmp.le.s32.totalorder %v272_v3, 16  ;;  %s238_s11 = smul.u32 12, %s1557_s18 }
  0x11   : > { %vm1647_vm3 = vmand %vm282_vm1, %vm288_vm2  ;;  %v273_v8 = vadd.s32 1, %v272_v3  ;;  %v274_v9 = vadd.s32 2, %v272_v3  ;;  %1489 = vmatpush.bf16.msra.mxu3 %v508_v2  ;;  %517 = vmatpush.bf16.msra.mxu0 %v508_v2  ;;  %s1490_s6 = smul.u32 432, %s2622_s19  ;;  %v1668_v12 = vld [vmem:[%s2485_s2] ss:$0 sm:$0xff]  ;;  %v712_v15 = vsel %vm2489_vm0, %v1415_v13, 0 }
  0x12   : > { %v1658_v10 = vadd.s32 16, %v1644_v5  ;;  %vm287_vm4 = vcmp.ge.s32.totalorder %v277_v4, 1  ;;  %vm293_vm5 = vcmp.le.s32.totalorder %v277_v4, 16  ;;  %vm300_vm6 = vcmp.ge.s32.totalorder %v1644_v5, 1  ;;  %v466_v16 = vld [vmem:[%s2486_s3] sm:$0x3] }
  0x13   : > { %vm1661_vm7 = vmand %vm287_vm4, %vm293_vm5  ;;  %vm283_vm8 = vcmp.ge.s32.totalorder %v273_v8, 1  ;;  %s237_s13 = scalar_lea.vmem %s2483_s0, %s1490_s6  ;;  %vm284_vm11 = vcmp.ge.s32.totalorder %v274_v9, 1  ;;  %vm289_vm12 = vcmp.le.s32.totalorder %v273_v8, 16  ;;  %vm290_vm14 = vcmp.le.s32.totalorder %v274_v9, 16  ;;  %v1425_v21 = vld [vmem:[%s2486_s3 + $0x6] sm:$0x3] }
  0x14   : > { %vm1680_vm9 = vmand %vm1647_vm3, %vm300_vm6  ;;  %vm323_vm10 = vcmp.le.s32.totalorder %v1658_v10, 16  ;;  %s1689_s16 = scalar_lea.vmem %s237_s13, %s1395_s28  ;;  %721 = vmatpush.bf16.msrb.mxu2 %v712_v15  ;;  %v586_v18 = vsel %vm2489_vm0, %v466_v16, 0  ;;  %v275_v19 = vadd.s32 3, %v272_v3  ;;  %v276_v20 = vadd.s32 4, %v272_v3  ;;  %p241_p6 = scmp.lt.s32.totalorder %s238_s11, 47 }
  0x15   : > { %vm1695_vm13 = vmand %vm1661_vm7, %vm323_vm10  ;;  %v252_v22 = vld [vmem:[%s1689_s16] sm:$0xff]  ;;  %v269_v23 = vld [vmem:[%s1689_s16 + $0x88] sm:$0xff]  ;;  %595 = vmatpush.bf16.msrb.mxu1 %v586_v18  ;;  %v813_v25 = vsel %vm2489_vm0, %v1425_v21, 0  ;;  %s1491_s12 = smul.u32 48, %s2622_s19 }
  0x16   : > { %v257_v24 = vld [vmem:[%s1689_s16 + $0x28] sm:$0xff]  ;;  %v345_v26 = vmul.f32 %v1654_v7, %v252_v22  ;;  %v362_v27 = vmul.f32 %v1654_v7, %v269_v23  ;;  %v258_v28 = vld [vmem:[%s1689_s16 + $0x30] sm:$0xff]  ;;  %vm1712_vm15 = vmand %vm283_vm8, %vm289_vm12  ;;  %vm285_vm1 = vcmp.ge.s32.totalorder %v275_v19, 1  ;;  %822 = vmatpush.bf16.msrb.mxu3 %v813_v25  ;;  %vm286_vm4 = vcmp.ge.s32.totalorder %v276_v20, 1  ;;  %s2624_s11 = smov (!%p241_p6, %s238_s11), 47 }
  0x17   : > { %v350_v30 = vmul.f32 %v1654_v7, %v257_v24  ;;  %v263_v31 = vld [vmem:[%s1689_s16 + $0x58] sm:$0xff]  ;;  %vm1720_vm2 = vmand %vm284_vm11, %vm290_vm14  ;;  %v351_v33 = vmul.f32 %v1654_v7, %v258_v28  ;;  %v264_v34 = vld [vmem:[%s1689_s16 + $0x60] sm:$0xff]  ;;  %vm291_vm5 = vcmp.le.s32.totalorder %v275_v19, 16  ;;  %vm292_vm8 = vcmp.le.s32.totalorder %v276_v20, 16  ;;  %s244_s13 = sadd.s32 %s1491_s12, %s2624_s11 }
  0x18   : > { %v366_v35 = vadd.f32 %v1668_v12, %v345_v26  ;;  %v383_v36 = vadd.f32 %v1668_v12, %v362_v27  ;;  %vm1732_vm12 = vmand %vm1720_vm2, %vm300_vm6  ;;  %v356_v39 = vmul.f32 %v1654_v7, %v263_v31  ;;  %v253_v40 = vld [vmem:[%s1689_s16 + $0x8] sm:$0xff]  ;;  %v254_v41 = vld [vmem:[%s1689_s16 + $0x10] sm:$0xff]  ;;  %v357_v44 = vmul.f32 %v1654_v7, %v264_v34  ;;  %s1393_s14 = sshll.u32 %s244_s13, 3 }
  0x19   : > { %v371_v38 = vadd.f32 %v1668_v12, %v350_v30  ;;  %vm1744_vm14 = vmand %vm1712_vm15, %vm323_vm10  ;;  %v372_v43 = vadd.f32 %v1668_v12, %v351_v33  ;;  %v346_v53 = vmul.f32 %v1654_v7, %v253_v40  ;;  %v347_v54 = vmul.f32 %v1654_v7, %v254_v41  ;;  %v259_v55 = vld [vmem:[%s1689_s16 + $0x38] sm:$0xff]  ;;  %v260_v60 = vld [vmem:[%s1689_s16 + $0x40] sm:$0xff]  ;;  %s2419_s19 = scalar_lea.vmem %s2488_s5, %s1393_s14 }
  0x1a   : > { %v384_v45 = vmax.f32 %v366_v35, 0.0  ;;  %v401_v46 = vmax.f32 %v383_v36, 0.0  ;;  %vm1752_vm0 = vmand %vm285_vm1, %vm291_vm5  ;;  %v377_v49 = vadd.f32 %v1668_v12, %v356_v39  ;;  %v378_v52 = vadd.f32 %v1668_v12, %v357_v44  ;;  %v265_v61 = vld [vmem:[%s1689_s16 + $0x68] sm:$0xff]  ;;  %v266_v63 = vld [vmem:[%s1689_s16 + $0x70] sm:$0xff] }
  0x1b   : > { %v389_v47 = vmax.f32 %v371_v38, 0.0  ;;  %v390_v50 = vmax.f32 %v372_v43, 0.0  ;;  %vm1759_vm11 = vmand %vm286_vm4, %vm292_vm8  ;;  %v367_v4 = vadd.f32 %v1668_v12, %v346_v53  ;;  %v352_v8 = vmul.f32 %v1654_v7, %v259_v55  ;;  %v267_v17 = vld [vmem:[%s1689_s16 + $0x78] sm:$0xff]  ;;  %v268_v18 = vld [vmem:[%s1689_s16 + $0x80] sm:$0xff] }
  0x1c   : > { %v1769_v56 = vsel %vm1680_vm9, %v384_v45, 0.0  ;;  %v1773_v57 = vsel %vm1695_vm13, %v401_v46, 0.0  ;;  %vm315_vm1 = vmand %vm1759_vm11, %vm300_vm6  ;;  %v395_v59 = vmax.f32 %v377_v49, 0.0  ;;  %v396_v1 = vmax.f32 %v378_v52, 0.0  ;;  %v1435_v34 = vld [vmem:[%s2486_s3 + $0x8] sm:$0x3] }
  0x1d   : > { %v1777_v58 = vsel %vm1744_vm14, %v389_v47, 0.0  ;;  %v1787_v62 = vpack.c.bf16 %v1769_v56, %v1773_v57  ;;  %vm335_vm9 = vmand %vm1752_vm0, %vm323_vm10  ;;  %v1796_v0 = vsel %vm1732_vm12, %v390_v50, 0.0  ;;  %vm2514_vm13 = vcmask 31744   ;;  %v255_v41 = vld [vmem:[%s1689_s16 + $0x18] sm:$0xff]  ;;  %v256_v42 = vld [vmem:[%s1689_s16 + $0x20] sm:$0xff] }
  0x1e   : > { %v1798_v2 = vsel %vm335_vm9, %v395_v59, 0.0  ;;  %v1804_v3 = vpack.c.bf16 %v1796_v0, %v1777_v58  ;;  %v353_v9 = vmul.f32 %v1654_v7, %v260_v60  ;;  %v1809_v13 = vsel %vm315_vm1, %v396_v1, 0.0  ;;  %vm2515_vm4 = vmmov %vm2514_vm13  ;;  %v261_v10 = vld [vmem:[%s1689_s16 + $0x48] sm:$0xff]  ;;  %v262_v50 = vld [vmem:[%s1689_s16 + $0x50] sm:$0xff] }
  0x1f   : > { %1398 = vmatmul.msk.bf16.vlgmr.msra.gmra.mxu1 %vm2514_vm13, %v1787_v62  ;;  %v368_v14 = vadd.f32 %v1668_v12, %v347_v54  ;;  %v358_v15 = vmul.f32 %v1654_v7, %v265_v61  ;;  %v359_v16 = vmul.f32 %v1654_v7, %v266_v63  ;;  %v1820_v19 = vpack.c.bf16 %v1809_v13, %v1798_v2  ;;  %vm2516_vm5 = vmmov %vm2515_vm4  ;;  %v1465_v1 = vld [vmem:[%s2486_s3 + $0xe] sm:$0x3] }
  0x20   : > { %1401 = vmatmul.msk.bf16.vlgmr.msra.gmra.mxu2 %vm2515_vm4, %v1804_v3  ;;  %v373_v20 = vadd.f32 %v1668_v12, %v352_v8  ;;  %v374_v21 = vadd.f32 %v1668_v12, %v353_v9  ;;  %v385_v22 = vmax.f32 %v367_v4, 0.0  ;;  %v360_v23 = vmul.f32 %v1654_v7, %v267_v17  ;;  %vm326_vm8 = vmand %vm1647_vm3, %vm323_vm10  ;;  %v1445_v4 = vld [vmem:[%s2486_s3 + $0xa] sm:$0x3] }
  0x21   : > { %1404 = vmatmul.msk.bf16.vlgmr.msra.gmra.mxu3 %vm2516_vm5, %v1820_v19  ;;  %v361_v24 = vmul.f32 %v1654_v7, %v268_v18  ;;  %v386_v25 = vmax.f32 %v368_v14, 0.0  ;;  %v379_v26 = vadd.f32 %v1668_v12, %v358_v15  ;;  %v380_v27 = vadd.f32 %v1668_v12, %v359_v16  ;;  %vm318_vm12 = vmand %vm1661_vm7, %vm300_vm6  ;;  %v1475_v16 = vld [vmem:[%s2486_s3 + $0x10] sm:$0x3] }
  0x22   : > { %v381_v28 = vadd.f32 %v1668_v12, %v360_v23  ;;  %v391_v31 = vmax.f32 %v373_v20, 0.0  ;;  %v392_v33 = vmax.f32 %v374_v21, 0.0  ;;  %v1845_v35 = vsel %vm1647_vm3, %v385_v22, 0.0  ;;  %vm332_vm14 = vmand %vm1720_vm2, %vm323_vm10 }
  0x23   : > { %v382_v30 = vadd.f32 %v1668_v12, %v361_v24  ;;  %v1851_v37 = vsel %vm326_vm8, %v386_v25, 0.0  ;;  %v397_v38 = vmax.f32 %v379_v26, 0.0  ;;  %v398_v39 = vmax.f32 %v380_v27, 0.0  ;;  %vm338_vm1 = vmand %vm1759_vm11, %vm323_vm10 }
  0x24   : > { %v399_v36 = vmax.f32 %v381_v28, 0.0  ;;  %vm2517_vm3 = vcmask 1041408   ;;  %v1864_v44 = vsel %vm1720_vm2, %v391_v31, 0.0  ;;  %v1866_v45 = vsel %vm332_vm14, %v392_v33, 0.0  ;;  %vm2519_vm10 = vmmov %vm2515_vm4 }
  0x25   : > { %v400_v40 = vmax.f32 %v382_v30, 0.0  ;;  %v914_v43 = vsel %vm2517_vm3, %v1435_v34, 0  ;;  %v1875_v47 = vpack.c.bf16 %v1851_v37, %v1845_v35  ;;  %v1884_v32 = vsel %vm1759_vm11, %v397_v38, 0.0  ;;  %vm2520_vm2 = vmmov %vm2515_vm4 }
  0x26   : > { %v1857_v6 = vsel %vm318_vm12, %v399_v36, 0.0  ;;  %923 = vmatpush.bf16.msrb.mxu0 %v914_v43  ;;  %v1886_v52 = vsel %vm338_vm1, %v398_v39, 0.0  ;;  %v348_v11 = vmul.f32 %v1654_v7, %v255_v41  ;;  %v349_v53 = vmul.f32 %v1654_v7, %v256_v42  ;;  %vm2521_vm11 = vmmov %vm2517_vm3 }
  0x27   : > { %v1870_v46 = vsel %vm1661_vm7, %v400_v40, 0.0  ;;  %v1892_v54 = vpack.c.bf16 %v1866_v45, %v1864_v44  ;;  %vm2518_vm7 = vmmov %vm2515_vm4  ;;  %v354_v55 = vmul.f32 %v1654_v7, %v261_v10  ;;  %v355_v59 = vmul.f32 %v1654_v7, %v262_v50  ;;  %v1455_v7 = vld [vmem:[%s2486_s3 + $0xc] sm:$0x3] }
  0x28   : > { %v1879_v49 = vpack.c.bf16 %v1870_v46, %v1857_v6  ;;  %v1902_v51 = vpack.c.bf16 %v1886_v52, %v1884_v32  ;;  %v369_v60 = vadd.f32 %v1668_v12, %v348_v11  ;;  %v370_v61 = vadd.f32 %v1668_v12, %v349_v53  ;;  %vm2522_vm9 = vmmov %vm2517_vm3 }
  0x29   : > { %v375_v63 = vadd.f32 %v1668_v12, %v354_v55  ;;  %v376_v8 = vadd.f32 %v1668_v12, %v355_v59  ;;  %v1080_v9 = vsel %vm2521_vm11, %v1455_v7, 0  ;;  %v1145_v14 = vsel %vm2522_vm9, %v1465_v1, 0  ;;  %vm2523_vm13 = vmmov %vm2517_vm3 }
  0x2a   : > { %1397 = vmatmul.msk.bf16.vlgmr.msra.gmra.mxu0 %vm2518_vm7, %v1879_v49  ;;  %v1015_v15 = vsel %vm2523_vm13, %v1445_v4, 0  ;;  %vm2524_vm4 = vmmov %vm2520_vm2  ;;  %1089 = vmatpush.bf16.msra.mxu2 %v1080_v9  ;;  %v387_v18 = vmax.f32 %v369_v60, 0.0  ;;  %v388_v20 = vmax.f32 %v370_v61, 0.0  ;;  %v420_v22 = vrot.slane %v1769_v56, 7 }
  0x2b   : > { %vm2525_vm5 = vmmov %vm2517_vm3  ;;  %1154 = vmatpush.bf16.msra.mxu3 %v1145_v14  ;;  %1024 = vmatpush.bf16.msra.mxu1 %v1015_v15  ;;  %v393_v12 = vmax.f32 %v375_v63, 0.0  ;;  %v394_v21 = vmax.f32 %v376_v8, 0.0  ;;  %v437_v23 = vrot.slane %v1773_v57, 7  ;;  %v421_v24 = vrot.slane %v1845_v35, 7 }
  0x2c   : > { %v1210_v17 = vsel %vm2525_vm5, %v1475_v16, 0  ;;  %vm306_vm8 = vmand %vm1712_vm15, %vm300_vm6  ;;  %v1941_v26 = vsel %vm1712_vm15, %v388_v20, 0.0  ;;  %vm438_vm14 = vcmp.lt.s32.totalorder %v1644_v5, 1  ;;  %v875_v27 = vpack.c.bf16 %v1845_v35, %v1769_v56 }
  0x2d   : > { %1219 = vmatpush.bf16.msra.mxu0 %v1210_v17  ;;  %vm312_vm12 = vmand %vm1752_vm0, %vm300_vm6  ;;  %v405_v25 = vsel %vm306_vm8, %v387_v18, 0.0  ;;  %v1950_v30 = vsel %vm1752_vm0, %v394_v21, 0.0  ;;  %v653_v31 = vrot.slane %v1773_v57, 1  ;;  %v652_v29 = vrot.slane %v1870_v46, 1 }
  0x2e   : > { %v1946_v28 = vsel %vm312_vm12, %v393_v12, 0.0  ;;  %v1954_v33 = vpack.c.bf16 %v1941_v26, %v405_v25  ;;  %v455_v34 = vsel %vm438_vm14, %v420_v22, %v421_v24  ;;  %v456_v36 = vsel %vm438_vm14, %v437_v23, %v420_v22  ;;  %vm2526_vm0 = vmmov %vm2520_vm2 }
  0x2f   : > { %1399 = vmatmul.msk.bf16.gmra.mxu1 %vm2519_vm10, %v1875_v47  ;;  %v636_v38 = vrot.slane %v1769_v56, 1  ;;  %vm654_vm6 = vcmp.lt.s32.totalorder %v1644_v5, 7  ;;  %v1965_v48 = vpack.c.bf16 %v1950_v30, %v1946_v28  ;;  %vm2527_vm15 = vmmov %vm2526_vm0  ;;  %v774_v39 = vpack.c.bf16 %v455_v34, %v456_v36 }
  0x30   : > { %1402 = vmatmul.msk.bf16.gmra.mxu2 %vm2520_vm2, %v1892_v54  ;;  %v1972_v40 = vsel %vm654_vm6, %v652_v29, %v653_v31  ;;  %vm2530_vm1 = vmmov %vm2526_vm0  ;;  %v434_v42 = vrot.slane %v1886_v52, 7  ;;  %v435_v43 = vrot.slane %v1857_v6, 7  ;;  %v436_v10 = vrot.slane %v1870_v46, 7 }
  0x31   : > { %1405 = vmatmul.msk.bf16.gmra.mxu3 %vm2524_vm4, %v1902_v51  ;;  %2528 = vst [vmem:[#allocation2_spill] sm:$0xff] %v1972_v40  ;;  %v1976_v41 = vsel %vm654_vm6, %v653_v31, %v636_v38  ;;  %vm2531_vm3 = vmmov %vm2526_vm0  ;;  %v2490_v50 = vrot.slane %v1857_v6, 1  ;;  %v422_v55 = vrot.slane %v1851_v37, 7  ;;  %v423_v59 = vrot.slane %v405_v25, 7 }
  0x32   : > { %2529 = vst [vmem:[#allocation3_spill] sm:$0xff] %v1976_v41  ;;  %v1989_v11 = vsel %vm438_vm14, %v435_v43, %v436_v10  ;;  %v1995_v53 = vsel %vm438_vm14, %v434_v42, %v435_v43  ;;  %v876_v60 = vpack.c.bf16 %v405_v25, %v1851_v37  ;;  %v637_v4 = vrot.slane %v1845_v35, 1  ;;  %vm2532_vm7 = vmmov %vm2526_vm0 }
  0x33   : > { %v2003_v61 = vsel %vm654_vm6, %v2490_v50, %v652_v29  ;;  %v2007_v63 = vpack.c.bf16 %v1989_v11, %v1995_v53  ;;  %v453_v7 = vsel %vm438_vm14, %v422_v55, %v423_v59  ;;  %v454_v1 = vsel %vm438_vm14, %v421_v24, %v422_v55  ;;  %vm2533_vm10 = vmmov %vm2526_vm0 }
  0x34   : > { %v638_v8 = vrot.slane %v1851_v37, 1  ;;  %v2017_v9 = vpack.c.bf16 %v1972_v40, %v2003_v61  ;;  %v775_v14 = vpack.c.bf16 %v453_v7, %v454_v1  ;;  %v2024_v15 = vsel %vm654_vm6, %v636_v38, %v637_v4  ;;  %vm2534_vm2 = vmmov %vm2526_vm0 }
  0x35   : > { %vm2535_vm11 = vmmov %vm2526_vm0  ;;  %v2037_v37 = vsel %vm438_vm14, %v436_v10, %v437_v23  ;;  %v424_v17 = vrot.slane %v1941_v26, 7  ;;  %v425_v18 = vrot.slane %v1777_v58, 7  ;;  %v877_v20 = vpack.c.bf16 %v1777_v58, %v1941_v26 }
  0x36   : > { %v2028_v16 = vsel %vm654_vm6, %v637_v4, %v638_v8  ;;  %v2044_v12 = vpack.c.bf16 %v456_v36, %v2037_v37  ;;  %v639_v24 = vrot.slane %v405_v25, 1  ;;  %v640_v23 = vrot.slane %v1941_v26, 1  ;;  %vm2536_vm9 = vmmov %vm2526_vm0 }
  0x37   : > { %v451_v21 = vsel %vm438_vm14, %v424_v17, %v425_v18  ;;  %v452_v22 = vsel %vm438_vm14, %v423_v59, %v424_v17  ;;  %vm2537_vm13 = vmmov %vm2526_vm0  ;;  %v426_v26 = vrot.slane %v1796_v0, 7  ;;  %v427_v38 = vrot.slane %v1864_v44, 7 }
  0x38   : > { %v776_v31 = vpack.c.bf16 %v451_v21, %v452_v22  ;;  %v2060_v29 = vsel %vm654_vm6, %v638_v8, %v639_v24  ;;  %v2064_v36 = vsel %vm654_vm6, %v639_v24, %v640_v23  ;;  %vm2538_vm4 = vmmov %vm2526_vm0  ;;  %v2075_v43 = vpack.c.bf16 %v454_v1, %v455_v34 }
  0x39   : > { %vm2539_vm5 = vmmov %vm2526_vm0  ;;  %v449_v10 = vsel %vm438_vm14, %v426_v26, %v427_v38  ;;  %v450_v55 = vsel %vm438_vm14, %v425_v18, %v426_v26  ;;  %v641_v59 = vrot.slane %v1777_v58, 1  ;;  %v2085_v4 = vpack.c.bf16 %v2060_v29, %v2028_v16 }
  0x3a   : > { %1436 = vmatmul.msk.bf16.vlgmr.msrb.gmra.mxu0 %vm2526_vm0, %v875_v27  ;;  %v2053_v27 = vpack.c.bf16 %v2024_v15, %v1976_v41  ;;  %2540 = vst [vmem:[#allocation4_spill] sm:$0xff] %v2075_v43  ;;  %vm2541_vm8 = vmmov %vm2526_vm0  ;;  %v777_v34 = vpack.c.bf16 %v449_v10, %v450_v55  ;;  %v879_v17 = vpack.c.bf16 %v1946_v28, %v1866_v45  ;;  %v650_v50 = vrot.slane %v1886_v52, 1 }
  0x3b   : > { %vm2542_vm12 = vmmov %vm2526_vm0  ;;  %v2092_v1 = vsel %vm654_vm6, %v640_v23, %v641_v59  ;;  %v2107_v18 = vpack.c.bf16 %v452_v22, %v453_v7  ;;  %v643_v23 = vrot.slane %v1864_v44, 1 }
  0x3c   : > { %v2117_v26 = vpack.c.bf16 %v2092_v1, %v2064_v36 }
  0x3f   : > { %1400 = vmatmul.msk.bf16.gmra.mxu1 %vm2527_vm15, %v1954_v33  ;;  %vm2543_vm15 = vmmov %vm2526_vm0 }
  0x40   : > { %1403 = vmatmul.msk.bf16.gmra.mxu2 %vm2530_vm1, %v1965_v48  ;;  %vm2544_vm1 = vmmov %vm2526_vm0 }
  0x41   : > { %1426 = vmatmul.msk.bf16.vlgmr.msrb.gmra.mxu3 %vm2531_vm3, %v774_v39  ;;  %v878_v39 = vpack.c.bf16 %v1864_v44, %v1796_v0  ;;  %vm2545_vm3 = vmmov %vm2526_vm0 }
  0x4a   : > { %1437 = vmatmul.msk.bf16.gmra.mxu0 %vm2532_vm7, %v876_v60  ;;  %v642_v60 = vrot.slane %v1796_v0, 1  ;;  %v428_v0 = vrot.slane %v1866_v45, 7  ;;  %vm2546_vm7 = vmmov %vm2526_vm0 }
  0x4c   : > { %v2096_v8 = vsel %vm654_vm6, %v641_v59, %v642_v60  ;;  %v448_v24 = vsel %vm438_vm14, %v427_v38, %v428_v0  ;;  %v2124_v22 = vsel %vm654_vm6, %v642_v60, %v643_v23  ;;  %v880_v59 = vpack.c.bf16 %v1798_v2, %v1950_v30 }
  0x4d   : > { %v2139_v60 = vpack.c.bf16 %v450_v55, %v451_v21 }
  0x4f   : > { %1406 = vmatmul.msk.bf16.vlgmr.msrb.gmra.mxu1 %vm2533_vm10, %v2007_v63  ;;  %vm2547_vm10 = vmmov %vm2526_vm0 }
  0x50   : > { %1416 = vmatmul.msk.bf16.vlgmr.msrb.gmra.mxu2 %vm2534_vm2, %v2017_v9  ;;  %vm2548_vm2 = vmmov %vm2526_vm0 }
  0x51   : > { %1427 = vmatmul.msk.bf16.gmra.mxu3 %vm2535_vm11, %v775_v14  ;;  %v429_v14 = vrot.slane %v1946_v28, 7  ;;  %vm2549_vm11 = vmmov %vm2526_vm0 }
  0x5a   : > { %1438 = vmatmul.msk.bf16.gmra.mxu0 %vm2536_vm9, %v877_v20  ;;  %v447_v20 = vsel %vm438_vm14, %v428_v0, %v429_v14  ;;  %vm2550_vm9 = vmmov %vm2526_vm0 }
  0x5b   : > { %v778_v7 = vpack.c.bf16 %v447_v20, %v448_v24 }
  0x5f   : > { %1407 = vmatmul.msk.bf16.gmra.mxu1 %vm2537_vm13, %v2044_v12  ;;  %vm2551_vm13 = vmmov %vm2526_vm0 }
  0x60   : > { %1417 = vmatmul.msk.bf16.gmra.mxu2 %vm2538_vm4, %v2053_v27  ;;  %vm2552_vm4 = vmmov %vm2526_vm0 }
  0x61   : > { %1428 = vmatmul.msk.bf16.gmra.mxu3 %vm2539_vm5, %v776_v31  ;;  %v644_v31 = vrot.slane %v1866_v45, 1  ;;  %v430_v45 = vrot.slane %v1950_v30, 7  ;;  %vm2553_vm5 = vmmov %vm2526_vm0 }
  0x63   : > { %v2128_v38 = vsel %vm654_vm6, %v643_v23, %v644_v31  ;;  %v446_v0 = vsel %vm438_vm14, %v429_v14, %v430_v45  ;;  %v646_v23 = vrot.slane %v1950_v30, 1  ;;  %v432_v30 = vrot.slane %v1809_v13, 7 }
  0x6a   : > { %1439 = vmatmul.msk.bf16.gmra.mxu0 %vm2541_vm8, %v878_v39  ;;  %v431_v39 = vrot.slane %v1798_v2, 7  ;;  %vm2554_vm8 = vmmov %vm2526_vm0 }
  0x6c   : > { %v444_v44 = vsel %vm438_vm14, %v431_v39, %v432_v30 }
  0x6f   : > { %1408 = vmatmul.msk.bf16.gmra.mxu1 %vm2542_vm12, %v2075_v43  ;;  %vm2555_vm12 = vmmov %vm2526_vm0 }
  0x70   : > { %1418 = vmatmul.msk.bf16.gmra.mxu2 %vm2526_vm0, %v2085_v4 }
  0x71   : > { %1429 = vmatmul.msk.bf16.gmra.mxu3 %vm2543_vm15, %v777_v34  ;;  %v445_v34 = vsel %vm438_vm14, %v430_v45, %v431_v39  ;;  %v433_v45 = vrot.slane %v1884_v32, 7  ;;  %vm2556_vm15 = vmmov %vm2526_vm0 }
  0x72   : > { %v779_v21 = vpack.c.bf16 %v445_v34, %v446_v0  ;;  %v2244_v40 = vpack.c.bf16 %v444_v44, %v445_v34 }
  0x7a   : > { %1440 = vmatmul.msk.bf16.gmra.mxu0 %vm2544_vm1, %v879_v17  ;;  %v645_v17 = vrot.slane %v1946_v28, 1  ;;  %v647_v28 = vrot.slane %v1798_v2, 1  ;;  %v649_v2 = vrot.slane %v1884_v32, 1  ;;  %vm2558_vm1 = vmmov %vm2526_vm0 }
  0x7c   : > { %v2156_v55 = vsel %vm654_vm6, %v644_v31, %v645_v17  ;;  %v2160_v14 = vsel %vm654_vm6, %v645_v17, %v646_v23  ;;  %v881_v31 = vpack.c.bf16 %v1884_v32, %v1809_v13  ;;  %v443_v17 = vsel %vm438_vm14, %v432_v30, %v433_v45 }
  0x7d   : > { %v2181_v58 = vpack.c.bf16 %v2156_v55, %v2128_v38  ;;  %v2233_v32 = vsel %vm654_vm6, %v649_v2, %v650_v50 }
  0x7f   : > { %1409 = vmatmul.msk.bf16.gmra.mxu1 %vm2545_vm3, %v2107_v18  ;;  %vm2559_vm3 = vmmov %vm2526_vm0 }
  0x80   : > { %1419 = vmatmul.msk.bf16.gmra.mxu2 %vm2546_vm7, %v2117_v26  ;;  %vm2560_vm7 = vmmov %vm2526_vm0 }
  0x81   : > { %1430 = vmatmul.msk.bf16.gmra.mxu3 %vm2547_vm10, %v778_v7  ;;  %v2149_v7 = vpack.c.bf16 %v2124_v22, %v2096_v8  ;;  %vm2561_vm10 = vmmov %vm2526_vm0 }
  0x8a   : > { %1441 = vmatmul.msk.bf16.gmra.mxu0 %vm2548_vm2, %v880_v59  ;;  %v2171_v59 = vpack.c.bf16 %v448_v24, %v449_v10  ;;  %v2188_v10 = vsel %vm654_vm6, %v646_v23, %v647_v28  ;;  %v882_v23 = vpack.c.bf16 %v1857_v6, %v1886_v52  ;;  %vm2562_vm2 = vmmov %vm2526_vm0 }
  0x8b   : > { %v2221_v43 = vpack.c.bf16 %v2188_v10, %v2160_v14 }
  0x8f   : > { %1410 = vmatmul.msk.bf16.gmra.mxu1 %vm2549_vm11, %v2139_v60  ;;  %vm2564_vm11 = vmmov %vm2526_vm0 }
  0x90   : > { %1420 = vmatmul.msk.bf16.gmra.mxu2 %vm2550_vm9, %v2149_v7  ;;  %vm2565_vm9 = vmmov %vm2526_vm0 }
  0x91   : > { %1431 = vmatmul.msk.bf16.gmra.mxu3 %vm2551_vm13, %v779_v21  ;;  %v648_v21 = vrot.slane %v1809_v13, 1  ;;  %vm2567_vm13 = vmmov %vm2526_vm0 }
  0x93   : > { %v2192_v24 = vsel %vm654_vm6, %v647_v28, %v648_v21  ;;  %v2207_v28 = vpack.c.bf16 %v446_v0, %v447_v20 }
  0x9a   : > { %1442 = vmatmul.msk.bf16.gmra.mxu0 %vm2552_vm4, %v881_v31  ;;  %vm2568_vm4 = vmmov %vm2526_vm0 }
  0x9c   : > { %v522_v56 = vpop.f32.mrf.mxu1 }
  0x9d   : > { %v780_v56 = vpack.c.bf16 %v443_v17, %v444_v44 }
  0x9f   : > { %1411 = vmatmul.msk.bf16.gmra.mxu1 %vm2553_vm5, %v2171_v59  ;;  %vm2570_vm5 = vmmov %vm2526_vm0 }
  0xa0   : > { %1421 = vmatmul.msk.bf16.gmra.mxu2 %vm2554_vm8, %v2181_v58  ;;  %vm2571_vm8 = vmmov %vm2526_vm0 }
  0xa1   : > { %1432 = vmatmul.msk.bf16.gmra.mxu3 %vm2555_vm12, %v780_v56  ;;  %v442_v56 = vsel %vm438_vm14, %v433_v45, %v434_v42  ;;  %vm2557_vm14 = vmmov %vm2526_vm0 }
  0xa2   : > { %v781_v0 = vpack.c.bf16 %v1995_v53, %v442_v56  ;;  %vm2572_vm12 = vmmov %vm2526_vm0 }
  0xa3   : > { %v2199_v13 = vpop.f32.mrf.mxu2 }
  0xa4   : > { %v2201_v39 = vpop.f32.mrf.mxu1  ;;  %v2203_v30 = vpop.f32.mrf.mxu3 }
  0xa7   : > { %v519_v31 = vpop.f32.mrf.mxu0 }
  0xa8   : > { %v2229_v31 = vsel %vm654_vm6, %v648_v21, %v649_v2  ;;  %v883_v21 = vpack.c.bf16 %v1773_v57, %v1870_v46  ;;  %v782_v57 = vpack.c.bf16 %v2037_v37, %v1989_v11 }
  0xa9   : > { %v2252_v52 = vpack.c.bf16 %v2229_v31, %v2192_v24 }
  0xaa   : > { %1443 = vmatmul.msk.bf16.gmra.mxu0 %vm2526_vm0, %v882_v23 }
  0xab   : > { %v2209_v25 = vpop.f32.mrf.mxu2 }
  0xac   : > { %v2211_v35 = vpop.f32.mrf.mxu1  ;;  %v553_v20 = vpop.f32.mrf.mxu3 }
  0xaf   : > { %1412 = vmatmul.msk.bf16.gmra.mxu1 %vm2556_vm15, %v2207_v28  ;;  %v520_v42 = vpop.f32.mrf.mxu0  ;;  %vm2574_vm15 = vmmov %vm2526_vm0 }
  0xb0   : > { %1422 = vmatmul.msk.bf16.gmra.mxu2 %vm2557_vm14, %v2221_v43  ;;  %vm2575_vm14 = vmmov %vm2526_vm0 }
  0xb1   : > { %1433 = vmatmul.msk.bf16.gmra.mxu3 %vm2558_vm1, %v781_v0  ;;  %vm2576_vm1 = vmmov %vm2526_vm0 }
  0xb3   : > { %v2240_v45 = vpop.f32.mrf.mxu2 }
  0xb4   : > { %v528_v53 = vpop.f32.mrf.mxu1  ;;  %v555_v23 = vpop.f32.mrf.mxu3 }
  0xb5   : > { %v2563_v23 = vrot.slane %v1857_v6, 1 }
  0xb7   : > { %v925_v20 = vpop.f32.mrf.mxu0 }
  0xba   : > { %1444 = vmatmul.msk.bf16.gmra.mxu0 %vm2559_vm3, %v883_v21  ;;  %v2270_v21 = vsel %vm654_vm6, %v650_v50, %v2563_v23  ;;  %vm2566_vm6 = vmmov %vm2526_vm0 }
  0xbb   : > { %v2246_v2 = vpop.f32.mrf.mxu2  ;;  %vm2577_vm3 = vmmov %vm2526_vm0 }
  0xbc   : > { %v2248_v41 = vpop.f32.mrf.mxu1  ;;  %v556_v0 = vpop.f32.mrf.mxu3 }
  0xbd   : > { %v2272_v0 = vpack.c.bf16 %v442_v56, %v443_v17 }
  0xbf   : > { %1413 = vmatmul.msk.bf16.gmra.mxu1 %vm2560_vm7, %v2244_v40  ;;  %v926_v46 = vpop.f32.mrf.mxu0  ;;  %vm2579_vm7 = vmmov %vm2526_vm0 }
  0xc0   : > { %1423 = vmatmul.msk.bf16.gmra.mxu2 %vm2561_vm10, %v2252_v52  ;;  %vm2580_vm10 = vmmov %vm2526_vm0 }
  0xc1   : > { %1434 = vmatmul.msk.bf16.gmra.mxu3 %vm2562_vm2, %v782_v57  ;;  %v2278_v57 = vpack.c.bf16 %v2270_v21, %v2233_v32  ;;  %vm2581_vm2 = vmmov %vm2526_vm0 }
  0xc3   : > { %v2262_v44 = vpop.f32.mrf.mxu2 }
  0xc4   : > { %v2264_v34 = vpop.f32.mrf.mxu1  ;;  %v824_v42 = vpop.f32.mrf.mxu3 }
  0xc7   : > { %v928_v20 = vpop.f32.mrf.mxu0 }
  0xc8   : > { %v2569_v20 = vpack.c.bf16 %v2028_v16, %v2024_v15 }
  0xca   : > { %1476 = vmatmul.msk.bf16.vlgmr.msra.gmra.mxu0 %vm2564_vm11, %v2117_v26  ;;  %vm2582_vm11 = vmmov %vm2526_vm0 }
  0xcb   : > { %v2274_v11 = vpop.f32.mrf.mxu2 }
  0xcc   : > { %v597_v37 = vpop.f32.mrf.mxu1  ;;  %v825_v46 = vpop.f32.mrf.mxu3 }
  0xcf   : > { %1414 = vmatmul.msk.bf16.gmra.mxu1 %vm2565_vm9, %v2272_v0  ;;  %v929_v5 = vpop.f32.mrf.mxu0  ;;  %vm2584_vm9 = vmmov %vm2526_vm0 }
  0xd0   : > { %1424 = vmatmul.msk.bf16.gmra.mxu2 %vm2566_vm6, %v2278_v57  ;;  %vm2585_vm6 = vmmov %vm2526_vm0 }
  0xd1   : > { %1466 = vmatmul.msk.bf16.vlgmr.msra.gmra.mxu3 %vm2567_vm13, %v1954_v33  ;;  %vm2586_vm13 = vmmov %vm2526_vm0 }
  0xd3   : > { %v723_v6 = vpop.f32.mrf.mxu2 }
  0xd4   : > { %v598_v50 = vpop.f32.mrf.mxu1  ;;  %v827_v17 = vpop.f32.mrf.mxu3 }
  0xd7   : > { %v932_v56 = vpop.f32.mrf.mxu0 }
  0xda   : > { %1477 = vmatmul.msk.bf16.gmra.mxu0 %vm2568_vm4, %v2149_v7  ;;  %vm2587_vm4 = vmmov %vm2526_vm0 }
  0xdb   : > { %v724_v42 = vpop.f32.mrf.mxu2 }
  0xdc   : > { %v600_v23 = vpop.f32.mrf.mxu1  ;;  %v828_v26 = vpop.f32.mrf.mxu3 }
  0xdf   : > { %1446 = vmatmul.msk.bf16.vlgmr.msra.gmra.mxu1 %vm2570_vm5, %v2569_v20  ;;  %v934_v37 = vpop.f32.mrf.mxu0  ;;  %v2573_v20 = vpack.c.bf16 %v2064_v36, %v2060_v29  ;;  %vm2589_vm5 = vmmov %vm2526_vm0 }
  0xe0   : > { %1456 = vmatmul.msk.bf16.vlgmr.msra.gmra.mxu2 %vm2571_vm8, %v2107_v18  ;;  %vm2590_vm8 = vmmov %vm2526_vm0 }
  0xe1   : > { %1467 = vmatmul.msk.bf16.gmra.mxu3 %vm2572_vm12, %v1804_v3  ;;  %vm2591_vm12 = vmmov %vm2526_vm0 }
  0xe3   : > { %v726_v33 = vpop.f32.mrf.mxu2 }
  0xe4   : > { %v601_v46 = vpop.f32.mrf.mxu1  ;;  %v831_v50 = vpop.f32.mrf.mxu3 }
  0xe5   : > { %v602_v6 = vadd.f32 %v601_v46, %v2201_v39 }
  0xe7   : > { %v937_v17 = vpop.f32.mrf.mxu0 }
  0xea   : > { %1478 = vmatmul.msk.bf16.gmra.mxu0 %vm2526_vm0, %v2181_v58 }
  0xeb   : > { %v727_v7 = vpop.f32.mrf.mxu2 }
  0xec   : > { %v604_v42 = vpop.f32.mrf.mxu1  ;;  %v762_v23 = vadd.f32 %v727_v7, %v602_v6  ;;  %v833_v16 = vpop.f32.mrf.mxu3 }
  0xed   : > { %v605_v15 = vadd.f32 %v604_v42, %v2211_v35 }
  0xee   : > { %v863_v18 = vadd.f32 %v828_v26, %v762_v23 }
  0xef   : > { %1447 = vmatmul.msk.bf16.gmra.mxu1 %vm2574_vm15, %v2573_v20  ;;  %v939_v39 = vpop.f32.mrf.mxu0  ;;  %vm2593_vm15 = vmmov %vm2526_vm0 }
  0xf0   : > { %1457 = vmatmul.msk.bf16.gmra.mxu2 %vm2575_vm14, %v2139_v60  ;;  %v2308_v3 = vadd.f32 %v929_v5, %v863_v18  ;;  %vm2594_vm14 = vmmov %vm2526_vm0 }
  0xf1   : > { %1468 = vmatmul.msk.bf16.gmra.mxu3 %vm2576_vm1, %v1892_v54  ;;  %v2578_v54 = vpack.c.bf16 %v2096_v8, %v2092_v1  ;;  %vm2595_vm1 = vmmov %vm2526_vm0 }
  0xf3   : > { %v730_v35 = vpop.f32.mrf.mxu2 }
  0xf4   : > { %v606_v33 = vpop.f32.mrf.mxu1  ;;  %v763_v46 = vadd.f32 %v730_v35, %v605_v15  ;;  %v836_v6 = vpop.f32.mrf.mxu3 }
  0xf5   : > { %v607_v58 = vadd.f32 %v606_v33, %v528_v53 }
  0xf6   : > { %v864_v26 = vadd.f32 %v831_v50, %v763_v46 }
  0xf7   : > { %v942_v29 = vpop.f32.mrf.mxu0 }
  0xf8   : > { %v2312_v7 = vadd.f32 %v932_v56, %v864_v26 }
  0xfa   : > { %1479 = vmatmul.msk.bf16.gmra.mxu0 %vm2577_vm3, %v2221_v43  ;;  %vm2596_vm3 = vmmov %vm2526_vm0 }
  0xfb   : > { %v732_v36 = vpop.f32.mrf.mxu2 }
  0xfc   : > { %v609_v42 = vpop.f32.mrf.mxu1  ;;  %v764_v23 = vadd.f32 %v732_v36, %v607_v58  ;;  %v838_v5 = vpop.f32.mrf.mxu3 }
  0xfd   : > { %v610_v60 = vadd.f32 %v609_v42, %v2248_v41 }
  0xfe   : > { %v865_v18 = vadd.f32 %v833_v16, %v764_v23 }
  0xff   : > { %1448 = vmatmul.msk.bf16.gmra.mxu1 %vm2579_vm7, %v2578_v54  ;;  %v944_v56 = vpop.f32.mrf.mxu0  ;;  %vm2598_vm7 = vmmov %vm2526_vm0 }
 0x100   : > { %1458 = vmatmul.msk.bf16.gmra.mxu2 %vm2580_vm10, %v2171_v59  ;;  %v2323_v53 = vadd.f32 %v934_v37, %v865_v18  ;;  %vm2599_vm10 = vmmov %vm2526_vm0 }
 0x101   : > { %1469 = vmatmul.msk.bf16.gmra.mxu3 %vm2581_vm2, %v1965_v48  ;;  %v2583_v48 = vpack.c.bf16 %v2128_v38, %v2124_v22  ;;  %vm2600_vm2 = vmmov %vm2526_vm0 }
 0x103   : > { %v735_v41 = vpop.f32.mrf.mxu2 }
 0x104   : > { %v611_v50 = vpop.f32.mrf.mxu1  ;;  %v765_v15 = vadd.f32 %v735_v41, %v610_v60  ;;  %v841_v16 = vpop.f32.mrf.mxu3 }
 0x105   : > { %v612_v43 = vadd.f32 %v611_v50, %v2264_v34 }
 0x106   : > { %v866_v20 = vadd.f32 %v836_v6, %v765_v15 }
 0x107   : > { %v947_v1 = vpop.f32.mrf.mxu0 }
 0x108   : > { %v2328_v35 = vadd.f32 %v937_v17, %v866_v20 }
 0x10a   : > { %1480 = vmatmul.msk.bf16.gmra.mxu0 %vm2582_vm11, %v2252_v52  ;;  %vm2601_vm11 = vmmov %vm2526_vm0 }
 0x10b   : > { %v737_v8 = vpop.f32.mrf.mxu2 }
 0x10c   : > { %v614_v33 = vpop.f32.mrf.mxu1  ;;  %v766_v46 = vadd.f32 %v737_v8, %v612_v43  ;;  %v843_v59 = vpop.f32.mrf.mxu3 }
 0x10d   : > { %v615_v58 = vadd.f32 %v614_v33, %v2199_v13 }
 0x10e   : > { %v867_v37 = vadd.f32 %v838_v5, %v766_v46 }
 0x10f   : > { %1449 = vmatmul.msk.bf16.gmra.mxu1 %vm2584_vm9, %v2583_v48  ;;  %v949_v17 = vpop.f32.mrf.mxu0  ;;  %vm2602_vm9 = vmmov %vm2526_vm0 }
 0x110   : > { %1459 = vmatmul.msk.bf16.gmra.mxu2 %vm2585_vm6, %v2207_v28  ;;  %v2338_v34 = vadd.f32 %v939_v39, %v867_v37  ;;  %vm2603_vm6 = vmmov %vm2526_vm0 }
 0x111   : > { %1470 = vmatmul.msk.bf16.gmra.mxu3 %vm2586_vm13, %v1820_v19  ;;  %v2588_v19 = vpack.c.bf16 %v2160_v14, %v2156_v55  ;;  %vm2604_vm13 = vmmov %vm2526_vm0 }
 0x113   : > { %v740_v6 = vpop.f32.mrf.mxu2 }
 0x114   : > { %v616_v52 = vpop.f32.mrf.mxu1  ;;  %v767_v26 = vadd.f32 %v740_v6, %v615_v58  ;;  %v846_v36 = vpop.f32.mrf.mxu3 }
 0x115   : > { %v617_v38 = vadd.f32 %v616_v52, %v2209_v25 }
 0x116   : > { %v868_v42 = vadd.f32 %v841_v16, %v767_v26 }
 0x117   : > { %v952_v22 = vpop.f32.mrf.mxu0 }
 0x118   : > { %v2343_v23 = vadd.f32 %v942_v29, %v868_v42 }
 0x11a   : > { %1481 = vmatmul.msk.bf16.gmra.mxu0 %vm2587_vm4, %v2278_v57  ;;  %vm2608_vm4 = vmmov %vm2526_vm0 }
 0x11b   : > { %v742_v60 = vpop.f32.mrf.mxu2 }
 0x11c   : > { %v619_v28 = vpop.f32.mrf.mxu1  ;;  %v768_v39 = vadd.f32 %v742_v60, %v617_v38  ;;  %v848_v13 = vpop.f32.mrf.mxu3 }
 0x11d   : > { %v620_v25 = vadd.f32 %v619_v28, %v2240_v45 }
 0x11e   : > { %v869_v5 = vadd.f32 %v843_v59, %v768_v39 }
 0x11f   : > { %1450 = vmatmul.msk.bf16.gmra.mxu1 %vm2589_vm5, %v2588_v19  ;;  %v954_v18 = vpop.f32.mrf.mxu0  ;;  %vm2610_vm5 = vmmov %vm2526_vm0 }
 0x120   : > { %1460 = vmatmul.msk.bf16.gmra.mxu2 %vm2590_vm8, %v2244_v40  ;;  %v2354_v29 = vadd.f32 %v944_v56, %v869_v5  ;;  %vm1288_vm8 = vcmask 64512  }
 0x121   : > { %1471 = vmatmul.msk.bf16.gmra.mxu3 %vm2591_vm12, %v1902_v51  ;;  %v2592_v51 = vpack.c.bf16 %v2192_v24, %v2188_v10 }
 0x123   : > { %v745_v54 = vpop.f32.mrf.mxu2 }
 0x124   : > { %v621_v57 = vpop.f32.mrf.mxu1  ;;  %v769_v41 = vadd.f32 %v745_v54, %v620_v25  ;;  %v851_v50 = vpop.f32.mrf.mxu3  ;;  %v2605_v25 = vld [vmem:[#allocation3_spill] sm:$0xff] }
 0x125   : > { %v622_v14 = vadd.f32 %v621_v57, %v2246_v2  ;;  %v2609_v57 = vld [vmem:[#allocation4_spill] sm:$0xff] }
 0x126   : > { %v870_v15 = vadd.f32 %v846_v36, %v769_v41 }
 0x127   : > { %v957_v55 = vpop.f32.mrf.mxu0 }
 0x128   : > { %v2359_v43 = vadd.f32 %v947_v1, %v870_v15 }
 0x12a   : > { %1482 = vmatmul.msk.bf16.gmra.mxu0 %vm2526_vm0, %v2017_v9 }
 0x12b   : > { %v747_v16 = vpop.f32.mrf.mxu2 }
 0x12c   : > { %v624_v40 = vpop.f32.mrf.mxu1  ;;  %v770_v56 = vadd.f32 %v747_v16, %v622_v14  ;;  %v853_v45 = vpop.f32.mrf.mxu3 }
 0x12d   : > { %v625_v2 = vadd.f32 %v624_v40, %v2262_v44 }
 0x12e   : > { %v871_v20 = vadd.f32 %v848_v13, %v770_v56 }
 0x12f   : > { %1451 = vmatmul.msk.bf16.gmra.mxu1 %vm2593_vm15, %v2592_v51  ;;  %v959_v8 = vpop.f32.mrf.mxu0 }
 0x130   : > { %1461 = vmatmul.msk.bf16.gmra.mxu2 %vm2594_vm14, %v2272_v0  ;;  %v2370_v1 = vadd.f32 %v949_v17, %v871_v20 }
 0x131   : > { %1472 = vmatmul.msk.bf16.gmra.mxu3 %vm2595_vm1, %v1879_v49  ;;  %v2597_v49 = vpack.c.bf16 %v2233_v32, %v2229_v31  ;;  %v983_v32 = vpack.c.bf16 %v2003_v61, %v2270_v21 }
 0x133   : > { %v750_v33 = vpop.f32.mrf.mxu2 }
 0x134   : > { %v626_v9 = vpop.f32.mrf.mxu1  ;;  %v771_v46 = vadd.f32 %v750_v33, %v625_v2  ;;  %v856_v59 = vpop.f32.mrf.mxu3 }
 0x135   : > { %v627_v24 = vadd.f32 %v626_v9, %v2274_v11 }
 0x136   : > { %v872_v37 = vadd.f32 %v851_v50, %v771_v46 }
 0x137   : > { %v961_v10 = vpop.f32.mrf.mxu0 }
 0x138   : > { %v2375_v48 = vadd.f32 %v952_v22, %v872_v37  ;;  %v2414_v37 = vld [vmem:[%s2487_s4] ss:$0 sm:$0xff] }
 0x13a   : > { %1483 = vmatmul.msk.bf16.gmra.mxu0 %vm2596_vm3, %v2053_v27 }
 0x13b   : > { %v752_v58 = vpop.f32.mrf.mxu2 }
 0x13c   : > { %v629_v0 = vpop.f32.mrf.mxu1  ;;  %v772_v17 = vadd.f32 %v752_v58, %v627_v24  ;;  %v858_v44 = vpop.f32.mrf.mxu3 }
 0x13d   : > { %v630_v11 = vadd.f32 %v629_v0, %v2203_v30 }
 0x13e   : > { %v873_v6 = vadd.f32 %v853_v45, %v772_v17 }
 0x13f   : > { %1452 = vmatmul.msk.bf16.gmra.mxu1 %vm2598_vm7, %v2597_v49  ;;  %v962_v26 = vpop.f32.mrf.mxu0 }
 0x140   : > { %1462 = vmatmul.msk.bf16.gmra.mxu2 %vm2599_vm10, %v2007_v63  ;;  %v2386_v52 = vadd.f32 %v954_v18, %v873_v6 }
 0x141   : > { %1473 = vmatmul.msk.bf16.gmra.mxu3 %vm2600_vm2, %v1787_v62 }
 0x143   : > { %v755_v36 = vpop.f32.mrf.mxu2 }
 0x144   : > { %v631_v27 = vpop.f32.mrf.mxu1  ;;  %v773_v42 = vadd.f32 %v755_v36, %v630_v11  ;;  %v860_v22 = vpop.f32.mrf.mxu3 }
 0x146   : > { %v874_v38 = vadd.f32 %v856_v59, %v773_v42 }
 0x147   : > { %v1221_v31 = vpop.f32.mrf.mxu0 }
 0x148   : > { %v2391_v60 = vadd.f32 %v957_v55, %v874_v38 }
 0x14a   : > { %1484 = vmatmul.msk.bf16.gmra.mxu0 %vm2601_vm11, %v2085_v4  ;;  %v2606_v4 = vld [vmem:[#allocation2_spill] sm:$0xff] }
 0x14b   : > { %v757_v63 = vpop.f32.mrf.mxu2  ;;  %v2607_v54 = vpack.c.bf16 %v2605_v25, %v2606_v4 }
 0x14c   : > { %v633_v28 = vpop.f32.mrf.mxu1  ;;  %v861_v30 = vpop.f32.mrf.mxu3 }
 0x14f   : > { %1453 = vmatmul.msk.bf16.gmra.mxu1 %vm2602_vm9, %v983_v32  ;;  %v1222_v62 = vpop.f32.mrf.mxu0 }
 0x150   : > { %1463 = vmatmul.msk.bf16.gmra.mxu2 %vm2603_vm6, %v2044_v12 }
 0x151   : > { %1474 = vmatmul.msk.bf16.gmra.mxu3 %vm2604_vm13, %v1875_v47 }
 0x153   : > { %v759_v39 = vpop.f32.mrf.mxu2 }
 0x154   : > { %v634_v13 = vpop.f32.mrf.mxu1  ;;  %v1156_v5 = vpop.f32.mrf.mxu3 }
 0x157   : > { %v1224_v61 = vpop.f32.mrf.mxu0 }
 0x15b   : > { %v760_v21 = vpop.f32.mrf.mxu2 }
 0x15c   : > { %v1026_v19 = vpop.f32.mrf.mxu1  ;;  %v1157_v18 = vpop.f32.mrf.mxu3 }
 0x15f   : > { %1454 = vmatmul.msk.bf16.gmra.mxu1 %vm2608_vm4, %v2607_v54  ;;  %v1225_v12 = vpop.f32.mrf.mxu0 }
 0x160   : > { %1464 = vmatmul.msk.bf16.gmra.mxu2 %vm2610_vm5, %v2609_v57 }
 0x163   : > { %v1091_v41 = vpop.f32.mrf.mxu2 }
 0x164   : > { %v1027_v47 = vpop.f32.mrf.mxu1  ;;  %v1159_v50 = vpop.f32.mrf.mxu3 }
 0x167   : > { %v1228_v15 = vpop.f32.mrf.mxu0 }
 0x16b   : > { %v1092_v55 = vpop.f32.mrf.mxu2 }
 0x16c   : > { %v1029_v14 = vpop.f32.mrf.mxu1  ;;  %v1160_v16 = vpop.f32.mrf.mxu3 }
 0x16f   : > { %v1230_v40 = vpop.f32.mrf.mxu0 }
 0x173   : > { %v1094_v56 = vpop.f32.mrf.mxu2 }
 0x174   : > { %v1030_v45 = vpop.f32.mrf.mxu1  ;;  %v1163_v20 = vpop.f32.mrf.mxu3 }
 0x175   : > { %v1065_v8 = vadd.f32 %v1030_v45, %v2308_v3 }
 0x177   : > { %v1233_v51 = vpop.f32.mrf.mxu0 }
 0x17b   : > { %v1095_v2 = vpop.f32.mrf.mxu2 }
 0x17c   : > { %v1033_v33 = vpop.f32.mrf.mxu1  ;;  %v1130_v9 = vadd.f32 %v1095_v2, %v1065_v8  ;;  %v1165_v46 = vpop.f32.mrf.mxu3 }
 0x17d   : > { %v1066_v58 = vadd.f32 %v1033_v33, %v2312_v7 }
 0x17e   : > { %v1195_v59 = vadd.f32 %v1160_v16, %v1130_v9 }
 0x17f   : > { %v1235_v3 = vpop.f32.mrf.mxu0 }
 0x180   : > { %v1260_v10 = vadd.f32 %v1225_v12, %v1195_v59 }
 0x182   : > { %v1276_v24 = vadd.f32 %v2414_v37, %v1260_v10 }
 0x183   : > { %v1098_v0 = vpop.f32.mrf.mxu2 }
 0x184   : > { %v1035_v17 = vpop.f32.mrf.mxu1  ;;  %1289 = vst.msk [vmem:[%s2419_s19] sm:$0xff] %vm1288_vm8, %v1276_v24  ;;  %v1131_v44 = vadd.f32 %v1098_v0, %v1066_v58  ;;  %v1168_v6 = vpop.f32.mrf.mxu3 }
 0x185   : > { %v1067_v27 = vadd.f32 %v1035_v17, %v2323_v53 }
 0x186   : > { %v1196_v49 = vadd.f32 %v1163_v20, %v1131_v44 }
 0x187   : > { %v1238_v11 = vpop.f32.mrf.mxu0 }
 0x188   : > { %v1261_v26 = vadd.f32 %v1228_v15, %v1196_v49 }
 0x18a   : > { %v1277_v36 = vadd.f32 %v2414_v37, %v1261_v26 }
 0x18b   : > { %v1100_v42 = vpop.f32.mrf.mxu2 }
 0x18c   : > { %v1038_v22 = vpop.f32.mrf.mxu1  ;;  %1290 = vst.msk [vmem:[%s2419_s19 + $0x8] sm:$0xff] %vm1288_vm8, %v1277_v36  ;;  %v1132_v38 = vadd.f32 %v1100_v42, %v1067_v27  ;;  %v1170_v7 = vpop.f32.mrf.mxu3 }
 0x18d   : > { %v1068_v30 = vadd.f32 %v1038_v22, %v2328_v35 }
 0x18e   : > { %v1197_v31 = vadd.f32 %v1165_v46, %v1132_v38 }
 0x18f   : > { %v1240_v63 = vpop.f32.mrf.mxu0 }
 0x190   : > { %v1262_v32 = vadd.f32 %v1230_v40, %v1197_v31 }
 0x192   : > { %v1278_v28 = vadd.f32 %v2414_v37, %v1262_v32 }
 0x193   : > { %v1103_v62 = vpop.f32.mrf.mxu2 }
 0x194   : > { %v1040_v39 = vpop.f32.mrf.mxu1  ;;  %1291 = vst.msk [vmem:[%s2419_s19 + $0x10] sm:$0xff] %vm1288_vm8, %v1278_v28  ;;  %v1133_v13 = vadd.f32 %v1103_v62, %v1068_v30  ;;  %v1173_v53 = vpop.f32.mrf.mxu3 }
 0x195   : > { %v1069_v18 = vadd.f32 %v1040_v39, %v2338_v34 }
 0x196   : > { %v1198_v5 = vadd.f32 %v1168_v6, %v1133_v13 }
 0x197   : > { %v1243_v21 = vpop.f32.mrf.mxu0 }
 0x198   : > { %v1263_v61 = vadd.f32 %v1233_v51, %v1198_v5 }
 0x19a   : > { %v1279_v19 = vadd.f32 %v2414_v37, %v1263_v61 }
 0x19b   : > { %v1105_v25 = vpop.f32.mrf.mxu2 }
 0x19c   : > { %v1043_v4 = vpop.f32.mrf.mxu1  ;;  %1292 = vst.msk [vmem:[%s2419_s19 + $0x18] sm:$0xff] %vm1288_vm8, %v1279_v19  ;;  %v1134_v54 = vadd.f32 %v1105_v25, %v1069_v18  ;;  %v1175_v35 = vpop.f32.mrf.mxu3 }
 0x19d   : > { %v1070_v50 = vadd.f32 %v1043_v4, %v2343_v23 }
 0x19e   : > { %v1199_v57 = vadd.f32 %v1170_v7, %v1134_v54 }
 0x19f   : > { %v1245_v41 = vpop.f32.mrf.mxu0 }
 0x1a0   : > { %v1264_v12 = vadd.f32 %v1235_v3, %v1199_v57 }
 0x1a2   : > { %v1280_v47 = vadd.f32 %v2414_v37, %v1264_v12 }
 0x1a3   : > { %v1108_v15 = vpop.f32.mrf.mxu2 }
 0x1a4   : > { %v1045_v55 = vpop.f32.mrf.mxu1  ;;  %1293 = vst.msk [vmem:[%s2419_s19 + $0x20] sm:$0xff] %vm1288_vm8, %v1280_v47  ;;  %v1135_v14 = vadd.f32 %v1108_v15, %v1070_v50  ;;  %v1178_v34 = vpop.f32.mrf.mxu3 }
 0x1a5   : > { %v1071_v20 = vadd.f32 %v1045_v55, %v2354_v29 }
 0x1a6   : > { %v1200_v16 = vadd.f32 %v1173_v53, %v1135_v14 }
 0x1a7   : > { %v1248_v56 = vpop.f32.mrf.mxu0 }
 0x1a8   : > { %v1265_v40 = vadd.f32 %v1238_v11, %v1200_v16 }
 0x1aa   : > { %v1281_v45 = vadd.f32 %v2414_v37, %v1265_v40 }
 0x1ab   : > { %v1110_v51 = vpop.f32.mrf.mxu2 }
 0x1ac   : > { %v1048_v8 = vpop.f32.mrf.mxu1  ;;  %1294 = vst.msk [vmem:[%s2419_s19 + $0x28] sm:$0xff] %vm1288_vm8, %v1281_v45  ;;  %v1136_v2 = vadd.f32 %v1110_v51, %v1071_v20  ;;  %v1180_v23 = vpop.f32.mrf.mxu3 }
 0x1ad   : > { %v1072_v10 = vadd.f32 %v1048_v8, %v2359_v43 }
 0x1ae   : > { %v1201_v33 = vadd.f32 %v1175_v35, %v1136_v2 }
 0x1af   : > { %v1250_v46 = vpop.f32.mrf.mxu0 }
 0x1b0   : > { %v1266_v9 = vadd.f32 %v1240_v63, %v1201_v33 }
 0x1b2   : > { %v1282_v59 = vadd.f32 %v2414_v37, %v1266_v9 }
 0x1b3   : > { %v1113_v3 = vpop.f32.mrf.mxu2 }
 0x1b4   : > { %v1050_v24 = vpop.f32.mrf.mxu1  ;;  %1295 = vst.msk [vmem:[%s2419_s19 + $0x30] sm:$0xff] %vm1288_vm8, %v1282_v59  ;;  %v1137_v58 = vadd.f32 %v1113_v3, %v1072_v10  ;;  %v1183_v29 = vpop.f32.mrf.mxu3 }
 0x1b5   : > { %v1073_v49 = vadd.f32 %v1050_v24, %v2370_v1 }
 0x1b6   : > { %v1202_v0 = vadd.f32 %v1178_v34, %v1137_v58 }
 0x1b7   : > { %v1253_v44 = vpop.f32.mrf.mxu0 }
 0x1b8   : > { %v1267_v17 = vadd.f32 %v1243_v21, %v1202_v0 }
 0x1ba   : > { %v1283_v6 = vadd.f32 %v2414_v37, %v1267_v17 }
 0x1bb   : > { %v1115_v26 = vpop.f32.mrf.mxu2 }
 0x1bc   : > { %v1053_v11 = vpop.f32.mrf.mxu1  ;;  %1296 = vst.msk [vmem:[%s2419_s19 + $0x38] sm:$0xff] %vm1288_vm8, %v1283_v6  ;;  %v1138_v36 = vadd.f32 %v1115_v26, %v1073_v49  ;;  %v1185_v43 = vpop.f32.mrf.mxu3 }
 0x1bd   : > { %v1074_v7 = vadd.f32 %v1053_v11, %v2375_v48 }
 0x1be   : > { %v1203_v27 = vadd.f32 %v1180_v23, %v1138_v36 }
 0x1bf   : > { %v1255_v22 = vpop.f32.mrf.mxu0 }
 0x1c0   : > { %v1268_v42 = vadd.f32 %v1245_v41, %v1203_v27 }
 0x1c2   : > { %v1284_v38 = vadd.f32 %v2414_v37, %v1268_v42 }
 0x1c3   : > { %v1118_v31 = vpop.f32.mrf.mxu2 }
 0x1c4   : > { %v1055_v32 = vpop.f32.mrf.mxu1  ;;  %1297 = vst.msk [vmem:[%s2419_s19 + $0x40] sm:$0xff] %vm1288_vm8, %v1284_v38  ;;  %v1139_v63 = vadd.f32 %v1118_v31, %v1074_v7  ;;  %v1188_v1 = vpop.f32.mrf.mxu3 }
 0x1c5   : > { %v1075_v13 = vadd.f32 %v1055_v32, %v2386_v52 }
 0x1c6   : > { %v1204_v28 = vadd.f32 %v1183_v29, %v1139_v63 }
 0x1c7   : > { %v1257_v62 = vpop.f32.mrf.mxu0 }
 0x1c8   : > { %v1269_v30 = vadd.f32 %v1248_v56, %v1204_v28 }
 0x1ca   : > { %v1285_v39 = vadd.f32 %v2414_v37, %v1269_v30 }
 0x1cb   : > { %v1120_v53 = vpop.f32.mrf.mxu2 }
 0x1cc   : > { %v1058_v5 = vpop.f32.mrf.mxu1  ;;  %1298 = vst.msk [vmem:[%s2419_s19 + $0x48] sm:$0xff] %vm1288_vm8, %v1285_v39  ;;  %v1140_v61 = vadd.f32 %v1120_v53, %v1075_v13  ;;  %v1190_v48 = vpop.f32.mrf.mxu3 }
 0x1cd   : > { %v1076_v4 = vadd.f32 %v1058_v5, %v2391_v60 }
 0x1ce   : > { %v1205_v21 = vadd.f32 %v1185_v43, %v1140_v61 }
 0x1cf   : > { %v1258_v18 = vpop.f32.mrf.mxu0 }
 0x1d0   : > { %v1270_v19 = vadd.f32 %v1250_v46, %v1205_v21 }
 0x1d2   : > { %v1286_v25 = vadd.f32 %v2414_v37, %v1270_v19 }
 0x1d3   : > { %v1123_v54 = vpop.f32.mrf.mxu2 }
 0x1d4   : > { %v1060_v35 = vpop.f32.mrf.mxu1  ;;  %1299 = vst.msk [vmem:[%s2419_s19 + $0x50] sm:$0xff] %vm1288_vm8, %v1286_v25  ;;  %v1141_v57 = vadd.f32 %v1123_v54, %v1076_v4  ;;  %v1192_v52 = vpop.f32.mrf.mxu3 }
 0x1d6   : > { %v1206_v12 = vadd.f32 %v1188_v1, %v1141_v57 }
 0x1d8   : > { %v1271_v41 = vadd.f32 %v1253_v44, %v1206_v12 }
 0x1da   : > { %v1287_v47 = vadd.f32 %v2414_v37, %v1271_v41 }
 0x1db   : > { %v1125_v50 = vpop.f32.mrf.mxu2 }
 0x1dc   : > { %v1062_v15 = vpop.f32.mrf.mxu1  ;;  %1300 = vst.msk [vmem:[%s2419_s19 + $0x58] sm:$0xff] %vm1288_vm8, %v1287_v47  ;;  %v1193_v55 = vpop.f32.mrf.mxu3 }
 0x1e3   : > { %v1127_v14 = vpop.f32.mrf.mxu2 }
 0x1e4   : > { %v1063_v34 = vpop.f32.mrf.mxu1 }
 0x1eb   : > { %v1128_v16 = vpop.f32.mrf.mxu2 }
 0x1ec PF: > { %s15_s22 = sadd.s32 1, %s1573_s22   ;;  %s2611_s18 = smov %s1565_s20 }
 0x1ed   : > { %p12_p7 = scmp.ge.s32.totalorder %s15_s22, 10   ;;  %s2612_s19 = smov %s1569_s21 }
 0x1ee   : > { %s2613_s20 = smov %s2616_s23  ;;  %s2614_s21 = smov %s2620_s24 }
 0x1ef   :  { %14 = sbr.rel (!%p12_p7) target bundleno = 3 (0x3), region = 79 }

</bundles_post_ra>
